<compile_context>
chip_gen: v6e
topology: v6e:2x2x1
jax: 0.10.0
libtpu: 0.0.40
codegen_flags: <defaults>
</compile_context>

<pallas_src>
import functools

import jax
import jax.numpy as jnp
from jax.experimental import pallas as pl
from jax.experimental.pallas import tpu as pltpu


def rls_kernel(p_ref, x_ref, e_ref, p_out_ref, w_upd_ref):
    # p_ref:     (TL, N*N)  flattened per-row P matrices (lane-dense)
    # x_ref:     (TL, N)    gathered inputs
    # e_ref:     (TL, 1)    gathered errors
    # p_out_ref: (TL, N*N)  updated P (aliased with p_ref's HBM buffer)
    # w_upd_ref: (TL, N)    weight update rows (scattered outside)
    n = x_ref.shape[-1]

    P = p_ref[...]                                   # (TL, N*N)
    x = x_ref[...]                                   # (TL, N)
    e = e_ref[...]                                   # (TL, 1)

    # Prs[l, j] = sum_k P[l, j, k] * x[l, k], computed from static lane slices
    # of the flat row (exact f32; stays in the lane-dense layout).
    prs_cols = [
        jnp.sum(P[:, j * n:(j + 1) * n] * x, axis=-1, keepdims=True)
        for j in range(n)
    ]
    Prs = jnp.concatenate(prs_cols, axis=-1)         # (TL, N)

    # Gain a = 1 / (1 + x . Prs).  Kept exact (numerically sensitive update).
    denom = 1.0 + jnp.sum(x * Prs, axis=-1, keepdims=True)   # (TL, 1)
    a = 1.0 / denom
    aPrs = a * Prs                                   # (TL, N), reused twice

    # Rank-1 correction built directly in the flat lane-dense layout:
    #   corr[l, j*N + k] = (a*Prs)[l, j] * Prs[l, k]
    corr = jnp.concatenate(
        [aPrs[:, j:j + 1] * Prs for j in range(n)], axis=-1)  # (TL, N*N)

    p_out_ref[...] = (P - corr).astype(p_out_ref.dtype)       # unmasked vst
    w_upd_ref[...] = (e * aPrs).astype(w_upd_ref.dtype)
    # TODO(synk): if N ever reaches >=128, switch Prs / corr to MXU dot_general.


@functools.partial(jax.jit, static_argnames=("max_rows_per_tile",))
def rls_complex_forward(P, w, inp, err, local, *, max_rows_per_tile=128):
    """Functional equivalent of RLS_complex.forward.

    Returns (new_P, new_w), matching the in-place PyTorch semantics:
        self.P -= P_updates ;  w[self.local] -= w_updates
    """
    local = jnp.asarray(local, dtype=jnp.int32)
    L, N, _ = P.shape
    NN = N * N

    # TODO(synk): for very large L, fuse this gather/scatter into the kernel
    # via PrefetchScalarGridSpec(num_scalar_prefetch=1) with `local` prefetched.
    x = inp[local].astype(jnp.float32)               # (L, N)
    e = err[local][:, None].astype(jnp.float32)      # (L, 1)
    P_flat = P.reshape(L, NN)                        # lane-dense view of P

    # Row tile: one full block for small L, else 128-row blocks
    # (128 * N*N * 4B = 512 KiB per P block; a few MiB total with
    # double-buffered in/out blocks + temps -> fits v5e/v6e/v7x VMEM).
    TL = L if L <= max_rows_per_tile else max_rows_per_tile
    grid = (pl.cdiv(L, TL),)

    new_P_flat, w_upd = pl.pallas_call(
        rls_kernel,
        out_shape=(
            jax.ShapeDtypeStruct((L, NN), P.dtype),
            jax.ShapeDtypeStruct((L, N), w.dtype),
        ),
        grid_spec=pltpu.PrefetchScalarGridSpec(
            num_scalar_prefetch=0,
            grid=grid,
            in_specs=[
                pl.BlockSpec((TL, NN), lambda l: (l, 0)),   # P (flat)
                pl.BlockSpec((TL, N), lambda l: (l, 0)),    # x
                pl.BlockSpec((TL, 1), lambda l: (l, 0)),    # error
            ],
            out_specs=(
                pl.BlockSpec((TL, NN), lambda l: (l, 0)),   # new P (flat)
                pl.BlockSpec((TL, N), lambda l: (l, 0)),    # w update rows
            ),
        ),
        input_output_aliases={0: 0},                 # new_P reuses P's buffer
        compiler_params=pltpu.CompilerParams(
            dimension_semantics=("parallel",),       # 2x on v7x's two TCs
            vmem_limit_bytes=32 * 1024 * 1024,
        ),
    )(P_flat, x, e)

    new_P = new_P_flat.reshape(L, N, N)
    new_w = w.at[local].add(-w_upd)
    return new_P, new_w


def _reference(P, w, inp, err, local):
    # Pure-JAX reference mirroring the torch einsums (exact f32 broadcast/sum).
    local = jnp.asarray(local, dtype=jnp.int32)
    x = inp[local]                                   # (L, N)
    e = err[local]                                   # (L,)
    Prs = jnp.sum(P * x[:, None, :], axis=-1)        # (L, N)
    a = 1.0 / (1.0 + jnp.sum(x * Prs, axis=-1))      # (L,)
    P_upd = a[:, None, None] * Prs[:, :, None] * Prs[:, None, :]
    w_upd = (a * e)[:, None] * Prs
    return P - P_upd, w.at[local].add(-w_upd)


if __name__ == "__main__":
    # Module config: N input nodes, `local` learned output positions, alpha lr.
    N = 32
    output_dim = 8
    local = [0, 2, 4, 6]
    alpha = 1.0

    # P = stack of alpha * I_N, one per local output (as in __init__ / n_reset).
    P0 = alpha * jnp.stack([jnp.eye(N, dtype=jnp.float32) for _ in local])  # (4,32,32)

    key = jax.random.PRNGKey(0)
    k_w, k_in, k_err = jax.random.split(key, 3)
    w0 = jax.random.normal(k_w, (output_dim, N), dtype=jnp.float32)
    inp = jax.random.normal(k_in, (output_dim, N), dtype=jnp.float32)
    err = jax.random.normal(k_err, (output_dim,), dtype=jnp.float32)

    local_idx = jnp.asarray(local, dtype=jnp.int32)

    # Reference first (before the aliasing kernel touches any buffers).
    ref_P, ref_w = _reference(P0, w0, inp, err, local_idx)

    new_P, new_w = rls_complex_forward(P0, w0, inp, err, local_idx)
    jax.block_until_ready((new_P, new_w))

    assert new_P.shape == P0.shape and new_w.shape == w0.shape
    assert jnp.allclose(new_P, ref_P, atol=1e-5, rtol=1e-5)
    assert jnp.allclose(new_w, ref_w, atol=1e-5, rtol=1e-5)

    print("KERNEL_OK")
</pallas_src>

<mosaic_0001>
module attributes {stable_mosaic.version = 11 : i64} {
  func.func @rls_kernel(%arg0: i32, %arg1: memref<4x1024xf32, #tpu.memory_space<vmem>>, %arg2: memref<4x32xf32, #tpu.memory_space<vmem>>, %arg3: memref<4x1xf32, #tpu.memory_space<vmem>>, %arg4: memref<4x1024xf32, #tpu.memory_space<vmem>>, %arg5: memref<4x32xf32, #tpu.memory_space<vmem>>) attributes {dimension_semantics = [#tpu.dimension_semantics<parallel>], iteration_bounds = array<i64: 1>, scalar_prefetch = 0 : i64, scratch_operands = 0 : i64, tpu.core_type = #tpu.core_type<tc>, window_params = [{transform_indices = @transform_0, window_bounds = array<i64: 4, 1024>}, {transform_indices = @transform_1, window_bounds = array<i64: 4, 32>}, {transform_indices = @transform_2, window_bounds = array<i64: 4, 1>}, {transform_indices = @transform_3, window_bounds = array<i64: 4, 1024>}, {transform_indices = @transform_4, window_bounds = array<i64: 4, 32>}]} {
    %c0 = arith.constant 0 : index
    %c0_0 = arith.constant 0 : index
    %0 = vector.load %arg1[%c0, %c0_0] : memref<4x1024xf32, #tpu.memory_space<vmem>>, vector<4x1024xf32>
    %c0_1 = arith.constant 0 : index
    %c0_2 = arith.constant 0 : index
    %1 = vector.load %arg2[%c0_1, %c0_2] : memref<4x32xf32, #tpu.memory_space<vmem>>, vector<4x32xf32>
    %c0_3 = arith.constant 0 : index
    %c0_4 = arith.constant 0 : index
    %2 = vector.load %arg3[%c0_3, %c0_4] : memref<4x1xf32, #tpu.memory_space<vmem>>, vector<4x1xf32>
    %3 = vector.extract_strided_slice %0 {offsets = [0, 0], sizes = [4, 32], strides = [1, 1]} : vector<4x1024xf32> to vector<4x32xf32>
    %4 = arith.mulf %3, %1 : vector<4x32xf32>
    %cst = arith.constant dense<0.000000e+00> : vector<4xf32>
    %5 = vector.multi_reduction <add>, %4, %cst [1] : vector<4x32xf32> to vector<4xf32>
    %6 = vector.shape_cast %5 : vector<4xf32> to vector<4x1xf32>
    %7 = vector.extract_strided_slice %0 {offsets = [0, 32], sizes = [4, 32], strides = [1, 1]} : vector<4x1024xf32> to vector<4x32xf32>
    %8 = arith.mulf %7, %1 : vector<4x32xf32>
    %cst_5 = arith.constant dense<0.000000e+00> : vector<4xf32>
    %9 = vector.multi_reduction <add>, %8, %cst_5 [1] : vector<4x32xf32> to vector<4xf32>
    %10 = vector.shape_cast %9 : vector<4xf32> to vector<4x1xf32>
    %11 = vector.extract_strided_slice %0 {offsets = [0, 64], sizes = [4, 32], strides = [1, 1]} : vector<4x1024xf32> to vector<4x32xf32>
    %12 = arith.mulf %11, %1 : vector<4x32xf32>
    %cst_6 = arith.constant dense<0.000000e+00> : vector<4xf32>
    %13 = vector.multi_reduction <add>, %12, %cst_6 [1] : vector<4x32xf32> to vector<4xf32>
    %14 = vector.shape_cast %13 : vector<4xf32> to vector<4x1xf32>
    %15 = vector.extract_strided_slice %0 {offsets = [0, 96], sizes = [4, 32], strides = [1, 1]} : vector<4x1024xf32> to vector<4x32xf32>
    %16 = arith.mulf %15, %1 : vector<4x32xf32>
    %cst_7 = arith.constant dense<0.000000e+00> : vector<4xf32>
    %17 = vector.multi_reduction <add>, %16, %cst_7 [1] : vector<4x32xf32> to vector<4xf32>
    %18 = vector.shape_cast %17 : vector<4xf32> to vector<4x1xf32>
    %19 = vector.extract_strided_slice %0 {offsets = [0, 128], sizes = [4, 32], strides = [1, 1]} : vector<4x1024xf32> to vector<4x32xf32>
    %20 = arith.mulf %19, %1 : vector<4x32xf32>
    %cst_8 = arith.constant dense<0.000000e+00> : vector<4xf32>
    %21 = vector.multi_reduction <add>, %20, %cst_8 [1] : vector<4x32xf32> to vector<4xf32>
    %22 = vector.shape_cast %21 : vector<4xf32> to vector<4x1xf32>
    %23 = vector.extract_strided_slice %0 {offsets = [0, 160], sizes = [4, 32], strides = [1, 1]} : vector<4x1024xf32> to vector<4x32xf32>
    %24 = arith.mulf %23, %1 : vector<4x32xf32>
    %cst_9 = arith.constant dense<0.000000e+00> : vector<4xf32>
    %25 = vector.multi_reduction <add>, %24, %cst_9 [1] : vector<4x32xf32> to vector<4xf32>
    %26 = vector.shape_cast %25 : vector<4xf32> to vector<4x1xf32>
    %27 = vector.extract_strided_slice %0 {offsets = [0, 192], sizes = [4, 32], strides = [1, 1]} : vector<4x1024xf32> to vector<4x32xf32>
    %28 = arith.mulf %27, %1 : vector<4x32xf32>
    %cst_10 = arith.constant dense<0.000000e+00> : vector<4xf32>
    %29 = vector.multi_reduction <add>, %28, %cst_10 [1] : vector<4x32xf32> to vector<4xf32>
    %30 = vector.shape_cast %29 : vector<4xf32> to vector<4x1xf32>
    %31 = vector.extract_strided_slice %0 {offsets = [0, 224], sizes = [4, 32], strides = [1, 1]} : vector<4x1024xf32> to vector<4x32xf32>
    %32 = arith.mulf %31, %1 : vector<4x32xf32>
    %cst_11 = arith.constant dense<0.000000e+00> : vector<4xf32>
    %33 = vector.multi_reduction <add>, %32, %cst_11 [1] : vector<4x32xf32> to vector<4xf32>
    %34 = vector.shape_cast %33 : vector<4xf32> to vector<4x1xf32>
    %35 = vector.extract_strided_slice %0 {offsets = [0, 256], sizes = [4, 32], strides = [1, 1]} : vector<4x1024xf32> to vector<4x32xf32>
    %36 = arith.mulf %35, %1 : vector<4x32xf32>
    %cst_12 = arith.constant dense<0.000000e+00> : vector<4xf32>
    %37 = vector.multi_reduction <add>, %36, %cst_12 [1] : vector<4x32xf32> to vector<4xf32>
    %38 = vector.shape_cast %37 : vector<4xf32> to vector<4x1xf32>
    %39 = vector.extract_strided_slice %0 {offsets = [0, 288], sizes = [4, 32], strides = [1, 1]} : vector<4x1024xf32> to vector<4x32xf32>
    %40 = arith.mulf %39, %1 : vector<4x32xf32>
    %cst_13 = arith.constant dense<0.000000e+00> : vector<4xf32>
    %41 = vector.multi_reduction <add>, %40, %cst_13 [1] : vector<4x32xf32> to vector<4xf32>
    %42 = vector.shape_cast %41 : vector<4xf32> to vector<4x1xf32>
    %43 = vector.extract_strided_slice %0 {offsets = [0, 320], sizes = [4, 32], strides = [1, 1]} : vector<4x1024xf32> to vector<4x32xf32>
    %44 = arith.mulf %43, %1 : vector<4x32xf32>
    %cst_14 = arith.constant dense<0.000000e+00> : vector<4xf32>
    %45 = vector.multi_reduction <add>, %44, %cst_14 [1] : vector<4x32xf32> to vector<4xf32>
    %46 = vector.shape_cast %45 : vector<4xf32> to vector<4x1xf32>
    %47 = vector.extract_strided_slice %0 {offsets = [0, 352], sizes = [4, 32], strides = [1, 1]} : vector<4x1024xf32> to vector<4x32xf32>
    %48 = arith.mulf %47, %1 : vector<4x32xf32>
    %cst_15 = arith.constant dense<0.000000e+00> : vector<4xf32>
    %49 = vector.multi_reduction <add>, %48, %cst_15 [1] : vector<4x32xf32> to vector<4xf32>
    %50 = vector.shape_cast %49 : vector<4xf32> to vector<4x1xf32>
    %51 = vector.extract_strided_slice %0 {offsets = [0, 384], sizes = [4, 32], strides = [1, 1]} : vector<4x1024xf32> to vector<4x32xf32>
    %52 = arith.mulf %51, %1 : vector<4x32xf32>
    %cst_16 = arith.constant dense<0.000000e+00> : vector<4xf32>
    %53 = vector.multi_reduction <add>, %52, %cst_16 [1] : vector<4x32xf32> to vector<4xf32>
    %54 = vector.shape_cast %53 : vector<4xf32> to vector<4x1xf32>
    %55 = vector.extract_strided_slice %0 {offsets = [0, 416], sizes = [4, 32], strides = [1, 1]} : vector<4x1024xf32> to vector<4x32xf32>
    %56 = arith.mulf %55, %1 : vector<4x32xf32>
    %cst_17 = arith.constant dense<0.000000e+00> : vector<4xf32>
    %57 = vector.multi_reduction <add>, %56, %cst_17 [1] : vector<4x32xf32> to vector<4xf32>
    %58 = vector.shape_cast %57 : vector<4xf32> to vector<4x1xf32>
    %59 = vector.extract_strided_slice %0 {offsets = [0, 448], sizes = [4, 32], strides = [1, 1]} : vector<4x1024xf32> to vector<4x32xf32>
    %60 = arith.mulf %59, %1 : vector<4x32xf32>
    %cst_18 = arith.constant dense<0.000000e+00> : vector<4xf32>
    %61 = vector.multi_reduction <add>, %60, %cst_18 [1] : vector<4x32xf32> to vector<4xf32>
    %62 = vector.shape_cast %61 : vector<4xf32> to vector<4x1xf32>
    %63 = vector.extract_strided_slice %0 {offsets = [0, 480], sizes = [4, 32], strides = [1, 1]} : vector<4x1024xf32> to vector<4x32xf32>
    %64 = arith.mulf %63, %1 : vector<4x32xf32>
    %cst_19 = arith.constant dense<0.000000e+00> : vector<4xf32>
    %65 = vector.multi_reduction <add>, %64, %cst_19 [1] : vector<4x32xf32> to vector<4xf32>
    %66 = vector.shape_cast %65 : vector<4xf32> to vector<4x1xf32>
    %67 = vector.extract_strided_slice %0 {offsets = [0, 512], sizes = [4, 32], strides = [1, 1]} : vector<4x1024xf32> to vector<4x32xf32>
    %68 = arith.mulf %67, %1 : vector<4x32xf32>
    %cst_20 = arith.constant dense<0.000000e+00> : vector<4xf32>
    %69 = vector.multi_reduction <add>, %68, %cst_20 [1] : vector<4x32xf32> to vector<4xf32>
    %70 = vector.shape_cast %69 : vector<4xf32> to vector<4x1xf32>
    %71 = vector.extract_strided_slice %0 {offsets = [0, 544], sizes = [4, 32], strides = [1, 1]} : vector<4x1024xf32> to vector<4x32xf32>
    %72 = arith.mulf %71, %1 : vector<4x32xf32>
    %cst_21 = arith.constant dense<0.000000e+00> : vector<4xf32>
    %73 = vector.multi_reduction <add>, %72, %cst_21 [1] : vector<4x32xf32> to vector<4xf32>
    %74 = vector.shape_cast %73 : vector<4xf32> to vector<4x1xf32>
    %75 = vector.extract_strided_slice %0 {offsets = [0, 576], sizes = [4, 32], strides = [1, 1]} : vector<4x1024xf32> to vector<4x32xf32>
    %76 = arith.mulf %75, %1 : vector<4x32xf32>
    %cst_22 = arith.constant dense<0.000000e+00> : vector<4xf32>
    %77 = vector.multi_reduction <add>, %76, %cst_22 [1] : vector<4x32xf32> to vector<4xf32>
    %78 = vector.shape_cast %77 : vector<4xf32> to vector<4x1xf32>
    %79 = vector.extract_strided_slice %0 {offsets = [0, 608], sizes = [4, 32], strides = [1, 1]} : vector<4x1024xf32> to vector<4x32xf32>
    %80 = arith.mulf %79, %1 : vector<4x32xf32>
    %cst_23 = arith.constant dense<0.000000e+00> : vector<4xf32>
    %81 = vector.multi_reduction <add>, %80, %cst_23 [1] : vector<4x32xf32> to vector<4xf32>
    %82 = vector.shape_cast %81 : vector<4xf32> to vector<4x1xf32>
    %83 = vector.extract_strided_slice %0 {offsets = [0, 640], sizes = [4, 32], strides = [1, 1]} : vector<4x1024xf32> to vector<4x32xf32>
    %84 = arith.mulf %83, %1 : vector<4x32xf32>
    %cst_24 = arith.constant dense<0.000000e+00> : vector<4xf32>
    %85 = vector.multi_reduction <add>, %84, %cst_24 [1] : vector<4x32xf32> to vector<4xf32>
    %86 = vector.shape_cast %85 : vector<4xf32> to vector<4x1xf32>
    %87 = vector.extract_strided_slice %0 {offsets = [0, 672], sizes = [4, 32], strides = [1, 1]} : vector<4x1024xf32> to vector<4x32xf32>
    %88 = arith.mulf %87, %1 : vector<4x32xf32>
    %cst_25 = arith.constant dense<0.000000e+00> : vector<4xf32>
    %89 = vector.multi_reduction <add>, %88, %cst_25 [1] : vector<4x32xf32> to vector<4xf32>
    %90 = vector.shape_cast %89 : vector<4xf32> to vector<4x1xf32>
    %91 = vector.extract_strided_slice %0 {offsets = [0, 704], sizes = [4, 32], strides = [1, 1]} : vector<4x1024xf32> to vector<4x32xf32>
    %92 = arith.mulf %91, %1 : vector<4x32xf32>
    %cst_26 = arith.constant dense<0.000000e+00> : vector<4xf32>
    %93 = vector.multi_reduction <add>, %92, %cst_26 [1] : vector<4x32xf32> to vector<4xf32>
    %94 = vector.shape_cast %93 : vector<4xf32> to vector<4x1xf32>
    %95 = vector.extract_strided_slice %0 {offsets = [0, 736], sizes = [4, 32], strides = [1, 1]} : vector<4x1024xf32> to vector<4x32xf32>
    %96 = arith.mulf %95, %1 : vector<4x32xf32>
    %cst_27 = arith.constant dense<0.000000e+00> : vector<4xf32>
    %97 = vector.multi_reduction <add>, %96, %cst_27 [1] : vector<4x32xf32> to vector<4xf32>
    %98 = vector.shape_cast %97 : vector<4xf32> to vector<4x1xf32>
    %99 = vector.extract_strided_slice %0 {offsets = [0, 768], sizes = [4, 32], strides = [1, 1]} : vector<4x1024xf32> to vector<4x32xf32>
    %100 = arith.mulf %99, %1 : vector<4x32xf32>
    %cst_28 = arith.constant dense<0.000000e+00> : vector<4xf32>
    %101 = vector.multi_reduction <add>, %100, %cst_28 [1] : vector<4x32xf32> to vector<4xf32>
    %102 = vector.shape_cast %101 : vector<4xf32> to vector<4x1xf32>
    %103 = vector.extract_strided_slice %0 {offsets = [0, 800], sizes = [4, 32], strides = [1, 1]} : vector<4x1024xf32> to vector<4x32xf32>
    %104 = arith.mulf %103, %1 : vector<4x32xf32>
    %cst_29 = arith.constant dense<0.000000e+00> : vector<4xf32>
    %105 = vector.multi_reduction <add>, %104, %cst_29 [1] : vector<4x32xf32> to vector<4xf32>
    %106 = vector.shape_cast %105 : vector<4xf32> to vector<4x1xf32>
    %107 = vector.extract_strided_slice %0 {offsets = [0, 832], sizes = [4, 32], strides = [1, 1]} : vector<4x1024xf32> to vector<4x32xf32>
    %108 = arith.mulf %107, %1 : vector<4x32xf32>
    %cst_30 = arith.constant dense<0.000000e+00> : vector<4xf32>
    %109 = vector.multi_reduction <add>, %108, %cst_30 [1] : vector<4x32xf32> to vector<4xf32>
    %110 = vector.shape_cast %109 : vector<4xf32> to vector<4x1xf32>
    %111 = vector.extract_strided_slice %0 {offsets = [0, 864], sizes = [4, 32], strides = [1, 1]} : vector<4x1024xf32> to vector<4x32xf32>
    %112 = arith.mulf %111, %1 : vector<4x32xf32>
    %cst_31 = arith.constant dense<0.000000e+00> : vector<4xf32>
    %113 = vector.multi_reduction <add>, %112, %cst_31 [1] : vector<4x32xf32> to vector<4xf32>
    %114 = vector.shape_cast %113 : vector<4xf32> to vector<4x1xf32>
    %115 = vector.extract_strided_slice %0 {offsets = [0, 896], sizes = [4, 32], strides = [1, 1]} : vector<4x1024xf32> to vector<4x32xf32>
    %116 = arith.mulf %115, %1 : vector<4x32xf32>
    %cst_32 = arith.constant dense<0.000000e+00> : vector<4xf32>
    %117 = vector.multi_reduction <add>, %116, %cst_32 [1] : vector<4x32xf32> to vector<4xf32>
    %118 = vector.shape_cast %117 : vector<4xf32> to vector<4x1xf32>
    %119 = vector.extract_strided_slice %0 {offsets = [0, 928], sizes = [4, 32], strides = [1, 1]} : vector<4x1024xf32> to vector<4x32xf32>
    %120 = arith.mulf %119, %1 : vector<4x32xf32>
    %cst_33 = arith.constant dense<0.000000e+00> : vector<4xf32>
    %121 = vector.multi_reduction <add>, %120, %cst_33 [1] : vector<4x32xf32> to vector<4xf32>
    %122 = vector.shape_cast %121 : vector<4xf32> to vector<4x1xf32>
    %123 = vector.extract_strided_slice %0 {offsets = [0, 960], sizes = [4, 32], strides = [1, 1]} : vector<4x1024xf32> to vector<4x32xf32>
    %124 = arith.mulf %123, %1 : vector<4x32xf32>
    %cst_34 = arith.constant dense<0.000000e+00> : vector<4xf32>
    %125 = vector.multi_reduction <add>, %124, %cst_34 [1] : vector<4x32xf32> to vector<4xf32>
    %126 = vector.shape_cast %125 : vector<4xf32> to vector<4x1xf32>
    %127 = vector.extract_strided_slice %0 {offsets = [0, 992], sizes = [4, 32], strides = [1, 1]} : vector<4x1024xf32> to vector<4x32xf32>
    %128 = arith.mulf %127, %1 : vector<4x32xf32>
    %cst_35 = arith.constant dense<0.000000e+00> : vector<4xf32>
    %129 = vector.multi_reduction <add>, %128, %cst_35 [1] : vector<4x32xf32> to vector<4xf32>
    %130 = vector.shape_cast %129 : vector<4xf32> to vector<4x1xf32>
    %131 = tpu.concatenate %6, %10, %14, %18, %22, %26, %30, %34, %38, %42, %46, %50, %54, %58, %62, %66 in 1 : vector<4x1xf32>, vector<4x1xf32>, vector<4x1xf32>, vector<4x1xf32>, vector<4x1xf32>, vector<4x1xf32>, vector<4x1xf32>, vector<4x1xf32>, vector<4x1xf32>, vector<4x1xf32>, vector<4x1xf32>, vector<4x1xf32>, vector<4x1xf32>, vector<4x1xf32>, vector<4x1xf32>, vector<4x1xf32> -> vector<4x16xf32>
    %132 = tpu.concatenate %70, %74, %78, %82, %86, %90, %94, %98, %102, %106, %110, %114, %118, %122, %126, %130 in 1 : vector<4x1xf32>, vector<4x1xf32>, vector<4x1xf32>, vector<4x1xf32>, vector<4x1xf32>, vector<4x1xf32>, vector<4x1xf32>, vector<4x1xf32>, vector<4x1xf32>, vector<4x1xf32>, vector<4x1xf32>, vector<4x1xf32>, vector<4x1xf32>, vector<4x1xf32>, vector<4x1xf32>, vector<4x1xf32> -> vector<4x16xf32>
    %133 = tpu.concatenate %131, %132 in 1 : vector<4x16xf32>, vector<4x16xf32> -> vector<4x32xf32>
    %134 = arith.mulf %1, %133 : vector<4x32xf32>
    %cst_36 = arith.constant dense<0.000000e+00> : vector<4xf32>
    %135 = vector.multi_reduction <add>, %134, %cst_36 [1] : vector<4x32xf32> to vector<4xf32>
    %136 = vector.shape_cast %135 : vector<4xf32> to vector<4x1xf32>
    %cst_37 = arith.constant 1.000000e+00 : f32
    %137 = vector.broadcast %cst_37 : f32 to vector<4x1xf32>
    %138 = arith.addf %137, %136 : vector<4x1xf32>
    %cst_38 = arith.constant 1.000000e+00 : f32
    %139 = vector.broadcast %cst_38 : f32 to vector<4x1xf32>
    %140 = arith.divf %139, %138 : vector<4x1xf32>
    %141 = vector.broadcast %140 : vector<4x1xf32> to vector<4x32xf32>
    %142 = arith.mulf %141, %133 : vector<4x32xf32>
    %143 = vector.extract_strided_slice %142 {offsets = [0, 0], sizes = [4, 1], strides = [1, 1]} : vector<4x32xf32> to vector<4x1xf32>
    %144 = vector.broadcast %143 : vector<4x1xf32> to vector<4x32xf32>
    %145 = arith.mulf %144, %133 : vector<4x32xf32>
    %146 = vector.extract_strided_slice %142 {offsets = [0, 1], sizes = [4, 1], strides = [1, 1]} : vector<4x32xf32> to vector<4x1xf32>
    %147 = vector.broadcast %146 : vector<4x1xf32> to vector<4x32xf32>
    %148 = arith.mulf %147, %133 : vector<4x32xf32>
    %149 = vector.extract_strided_slice %142 {offsets = [0, 2], sizes = [4, 1], strides = [1, 1]} : vector<4x32xf32> to vector<4x1xf32>
    %150 = vector.broadcast %149 : vector<4x1xf32> to vector<4x32xf32>
    %151 = arith.mulf %150, %133 : vector<4x32xf32>
    %152 = vector.extract_strided_slice %142 {offsets = [0, 3], sizes = [4, 1], strides = [1, 1]} : vector<4x32xf32> to vector<4x1xf32>
    %153 = vector.broadcast %152 : vector<4x1xf32> to vector<4x32xf32>
    %154 = arith.mulf %153, %133 : vector<4x32xf32>
    %155 = vector.extract_strided_slice %142 {offsets = [0, 4], sizes = [4, 1], strides = [1, 1]} : vector<4x32xf32> to vector<4x1xf32>
    %156 = vector.broadcast %155 : vector<4x1xf32> to vector<4x32xf32>
    %157 = arith.mulf %156, %133 : vector<4x32xf32>
    %158 = vector.extract_strided_slice %142 {offsets = [0, 5], sizes = [4, 1], strides = [1, 1]} : vector<4x32xf32> to vector<4x1xf32>
    %159 = vector.broadcast %158 : vector<4x1xf32> to vector<4x32xf32>
    %160 = arith.mulf %159, %133 : vector<4x32xf32>
    %161 = vector.extract_strided_slice %142 {offsets = [0, 6], sizes = [4, 1], strides = [1, 1]} : vector<4x32xf32> to vector<4x1xf32>
    %162 = vector.broadcast %161 : vector<4x1xf32> to vector<4x32xf32>
    %163 = arith.mulf %162, %133 : vector<4x32xf32>
    %164 = vector.extract_strided_slice %142 {offsets = [0, 7], sizes = [4, 1], strides = [1, 1]} : vector<4x32xf32> to vector<4x1xf32>
    %165 = vector.broadcast %164 : vector<4x1xf32> to vector<4x32xf32>
    %166 = arith.mulf %165, %133 : vector<4x32xf32>
    %167 = vector.extract_strided_slice %142 {offsets = [0, 8], sizes = [4, 1], strides = [1, 1]} : vector<4x32xf32> to vector<4x1xf32>
    %168 = vector.broadcast %167 : vector<4x1xf32> to vector<4x32xf32>
    %169 = arith.mulf %168, %133 : vector<4x32xf32>
    %170 = vector.extract_strided_slice %142 {offsets = [0, 9], sizes = [4, 1], strides = [1, 1]} : vector<4x32xf32> to vector<4x1xf32>
    %171 = vector.broadcast %170 : vector<4x1xf32> to vector<4x32xf32>
    %172 = arith.mulf %171, %133 : vector<4x32xf32>
    %173 = vector.extract_strided_slice %142 {offsets = [0, 10], sizes = [4, 1], strides = [1, 1]} : vector<4x32xf32> to vector<4x1xf32>
    %174 = vector.broadcast %173 : vector<4x1xf32> to vector<4x32xf32>
    %175 = arith.mulf %174, %133 : vector<4x32xf32>
    %176 = vector.extract_strided_slice %142 {offsets = [0, 11], sizes = [4, 1], strides = [1, 1]} : vector<4x32xf32> to vector<4x1xf32>
    %177 = vector.broadcast %176 : vector<4x1xf32> to vector<4x32xf32>
    %178 = arith.mulf %177, %133 : vector<4x32xf32>
    %179 = vector.extract_strided_slice %142 {offsets = [0, 12], sizes = [4, 1], strides = [1, 1]} : vector<4x32xf32> to vector<4x1xf32>
    %180 = vector.broadcast %179 : vector<4x1xf32> to vector<4x32xf32>
    %181 = arith.mulf %180, %133 : vector<4x32xf32>
    %182 = vector.extract_strided_slice %142 {offsets = [0, 13], sizes = [4, 1], strides = [1, 1]} : vector<4x32xf32> to vector<4x1xf32>
    %183 = vector.broadcast %182 : vector<4x1xf32> to vector<4x32xf32>
    %184 = arith.mulf %183, %133 : vector<4x32xf32>
    %185 = vector.extract_strided_slice %142 {offsets = [0, 14], sizes = [4, 1], strides = [1, 1]} : vector<4x32xf32> to vector<4x1xf32>
    %186 = vector.broadcast %185 : vector<4x1xf32> to vector<4x32xf32>
    %187 = arith.mulf %186, %133 : vector<4x32xf32>
    %188 = vector.extract_strided_slice %142 {offsets = [0, 15], sizes = [4, 1], strides = [1, 1]} : vector<4x32xf32> to vector<4x1xf32>
    %189 = vector.broadcast %188 : vector<4x1xf32> to vector<4x32xf32>
    %190 = arith.mulf %189, %133 : vector<4x32xf32>
    %191 = vector.extract_strided_slice %142 {offsets = [0, 16], sizes = [4, 1], strides = [1, 1]} : vector<4x32xf32> to vector<4x1xf32>
    %192 = vector.broadcast %191 : vector<4x1xf32> to vector<4x32xf32>
    %193 = arith.mulf %192, %133 : vector<4x32xf32>
    %194 = vector.extract_strided_slice %142 {offsets = [0, 17], sizes = [4, 1], strides = [1, 1]} : vector<4x32xf32> to vector<4x1xf32>
    %195 = vector.broadcast %194 : vector<4x1xf32> to vector<4x32xf32>
    %196 = arith.mulf %195, %133 : vector<4x32xf32>
    %197 = vector.extract_strided_slice %142 {offsets = [0, 18], sizes = [4, 1], strides = [1, 1]} : vector<4x32xf32> to vector<4x1xf32>
    %198 = vector.broadcast %197 : vector<4x1xf32> to vector<4x32xf32>
    %199 = arith.mulf %198, %133 : vector<4x32xf32>
    %200 = vector.extract_strided_slice %142 {offsets = [0, 19], sizes = [4, 1], strides = [1, 1]} : vector<4x32xf32> to vector<4x1xf32>
    %201 = vector.broadcast %200 : vector<4x1xf32> to vector<4x32xf32>
    %202 = arith.mulf %201, %133 : vector<4x32xf32>
    %203 = vector.extract_strided_slice %142 {offsets = [0, 20], sizes = [4, 1], strides = [1, 1]} : vector<4x32xf32> to vector<4x1xf32>
    %204 = vector.broadcast %203 : vector<4x1xf32> to vector<4x32xf32>
    %205 = arith.mulf %204, %133 : vector<4x32xf32>
    %206 = vector.extract_strided_slice %142 {offsets = [0, 21], sizes = [4, 1], strides = [1, 1]} : vector<4x32xf32> to vector<4x1xf32>
    %207 = vector.broadcast %206 : vector<4x1xf32> to vector<4x32xf32>
    %208 = arith.mulf %207, %133 : vector<4x32xf32>
    %209 = vector.extract_strided_slice %142 {offsets = [0, 22], sizes = [4, 1], strides = [1, 1]} : vector<4x32xf32> to vector<4x1xf32>
    %210 = vector.broadcast %209 : vector<4x1xf32> to vector<4x32xf32>
    %211 = arith.mulf %210, %133 : vector<4x32xf32>
    %212 = vector.extract_strided_slice %142 {offsets = [0, 23], sizes = [4, 1], strides = [1, 1]} : vector<4x32xf32> to vector<4x1xf32>
    %213 = vector.broadcast %212 : vector<4x1xf32> to vector<4x32xf32>
    %214 = arith.mulf %213, %133 : vector<4x32xf32>
    %215 = vector.extract_strided_slice %142 {offsets = [0, 24], sizes = [4, 1], strides = [1, 1]} : vector<4x32xf32> to vector<4x1xf32>
    %216 = vector.broadcast %215 : vector<4x1xf32> to vector<4x32xf32>
    %217 = arith.mulf %216, %133 : vector<4x32xf32>
    %218 = vector.extract_strided_slice %142 {offsets = [0, 25], sizes = [4, 1], strides = [1, 1]} : vector<4x32xf32> to vector<4x1xf32>
    %219 = vector.broadcast %218 : vector<4x1xf32> to vector<4x32xf32>
    %220 = arith.mulf %219, %133 : vector<4x32xf32>
    %221 = vector.extract_strided_slice %142 {offsets = [0, 26], sizes = [4, 1], strides = [1, 1]} : vector<4x32xf32> to vector<4x1xf32>
    %222 = vector.broadcast %221 : vector<4x1xf32> to vector<4x32xf32>
    %223 = arith.mulf %222, %133 : vector<4x32xf32>
    %224 = vector.extract_strided_slice %142 {offsets = [0, 27], sizes = [4, 1], strides = [1, 1]} : vector<4x32xf32> to vector<4x1xf32>
    %225 = vector.broadcast %224 : vector<4x1xf32> to vector<4x32xf32>
    %226 = arith.mulf %225, %133 : vector<4x32xf32>
    %227 = vector.extract_strided_slice %142 {offsets = [0, 28], sizes = [4, 1], strides = [1, 1]} : vector<4x32xf32> to vector<4x1xf32>
    %228 = vector.broadcast %227 : vector<4x1xf32> to vector<4x32xf32>
    %229 = arith.mulf %228, %133 : vector<4x32xf32>
    %230 = vector.extract_strided_slice %142 {offsets = [0, 29], sizes = [4, 1], strides = [1, 1]} : vector<4x32xf32> to vector<4x1xf32>
    %231 = vector.broadcast %230 : vector<4x1xf32> to vector<4x32xf32>
    %232 = arith.mulf %231, %133 : vector<4x32xf32>
    %233 = vector.extract_strided_slice %142 {offsets = [0, 30], sizes = [4, 1], strides = [1, 1]} : vector<4x32xf32> to vector<4x1xf32>
    %234 = vector.broadcast %233 : vector<4x1xf32> to vector<4x32xf32>
    %235 = arith.mulf %234, %133 : vector<4x32xf32>
    %236 = vector.extract_strided_slice %142 {offsets = [0, 31], sizes = [4, 1], strides = [1, 1]} : vector<4x32xf32> to vector<4x1xf32>
    %237 = vector.broadcast %236 : vector<4x1xf32> to vector<4x32xf32>
    %238 = arith.mulf %237, %133 : vector<4x32xf32>
    %239 = tpu.concatenate %145, %148, %151, %154, %157, %160, %163, %166, %169, %172, %175, %178, %181, %184, %187, %190 in 1 : vector<4x32xf32>, vector<4x32xf32>, vector<4x32xf32>, vector<4x32xf32>, vector<4x32xf32>, vector<4x32xf32>, vector<4x32xf32>, vector<4x32xf32>, vector<4x32xf32>, vector<4x32xf32>, vector<4x32xf32>, vector<4x32xf32>, vector<4x32xf32>, vector<4x32xf32>, vector<4x32xf32>, vector<4x32xf32> -> vector<4x512xf32>
    %240 = tpu.concatenate %193, %196, %199, %202, %205, %208, %211, %214, %217, %220, %223, %226, %229, %232, %235, %238 in 1 : vector<4x32xf32>, vector<4x32xf32>, vector<4x32xf32>, vector<4x32xf32>, vector<4x32xf32>, vector<4x32xf32>, vector<4x32xf32>, vector<4x32xf32>, vector<4x32xf32>, vector<4x32xf32>, vector<4x32xf32>, vector<4x32xf32>, vector<4x32xf32>, vector<4x32xf32>, vector<4x32xf32>, vector<4x32xf32> -> vector<4x512xf32>
    %241 = tpu.concatenate %239, %240 in 1 : vector<4x512xf32>, vector<4x512xf32> -> vector<4x1024xf32>
    %242 = arith.subf %0, %241 : vector<4x1024xf32>
    %c0_39 = arith.constant 0 : index
    %c0_40 = arith.constant 0 : index
    %243 = vector.load %arg4[%c0_39, %c0_40] : memref<4x1024xf32, #tpu.memory_space<vmem>>, vector<4x1024xf32>
    tpu.vector_store %arg4[%c0_39, %c0_40], %242 {strides = array<i32>} : memref<4x1024xf32, #tpu.memory_space<vmem>>, vector<4x1024xf32>,
    %244 = vector.broadcast %2 : vector<4x1xf32> to vector<4x32xf32>
    %245 = arith.mulf %244, %142 : vector<4x32xf32>
    %c0_41 = arith.constant 0 : index
    %c0_42 = arith.constant 0 : index
    %246 = vector.load %arg5[%c0_41, %c0_42] : memref<4x32xf32, #tpu.memory_space<vmem>>, vector<4x32xf32>
    tpu.vector_store %arg5[%c0_41, %c0_42], %245 {strides = array<i32>} : memref<4x32xf32, #tpu.memory_space<vmem>>, vector<4x32xf32>,
    return
  }
  func.func @transform_0(%arg0: i32) -> (i32, i32) {
    %c0_i32 = arith.constant 0 : i32
    %c0_i32_0 = arith.constant 0 : i32
    return %arg0, %c0_i32 : i32, i32
  }
  func.func @transform_1(%arg0: i32) -> (i32, i32) {
    %c0_i32 = arith.constant 0 : i32
    %c0_i32_0 = arith.constant 0 : i32
    return %arg0, %c0_i32 : i32, i32
  }
  func.func @transform_2(%arg0: i32) -> (i32, i32) {
    %c0_i32 = arith.constant 0 : i32
    %c0_i32_0 = arith.constant 0 : i32
    return %arg0, %c0_i32 : i32, i32
  }
  func.func @transform_3(%arg0: i32) -> (i32, i32) {
    %c0_i32 = arith.constant 0 : i32
    %c0_i32_0 = arith.constant 0 : i32
    return %arg0, %c0_i32 : i32, i32
  }
  func.func @transform_4(%arg0: i32) -> (i32, i32) {
    %c0_i32 = arith.constant 0 : i32
    %c0_i32_0 = arith.constant 0 : i32
    return %arg0, %c0_i32 : i32, i32
  }
}

</mosaic_0001>

<bundles_post_ra>
// kernel: rls_complex_forward.1
= control target key start
LH: loop header
LB: loop body
LE: loop exit
PB: predicated region body
PF: predicated region fallthrough
CT: control target
= control target key end

     0   :  { %vm23_vm0 = vcmask 257024   ;;  %s721_s19 = smov 96   ;;  %s722_s20 = smov 64   ;;  %vm269_vm1 = vcmask 7168   ;;  %vm271_vm2 = vcmask 15360   ;;  %vm273_vm3 = vcmask 23552   ;;  %s1140_s0 = inlined_call_operand.vmem [shape: f32[4,1024], index: 0, kind: input, shape index: {}, may-alias: {0,3}]   ;;  %s1141_s1 = inlined_call_operand.vmem [shape: f32[4,32], index: 1, kind: input, shape index: {}]   ;;  %s1142_s2 = inlined_call_operand.vmem [shape: f32[4,1], index: 2, kind: input, shape index: {}]   ;;  %s1143_s3 = inlined_call_operand.vmem [shape: f32[4,1024], index: 3, kind: output, shape index: {0}, may-alias: {0,3}]   ;;  %s1144_s4 = inlined_call_operand.vmem [shape: f32[4,32], index: 4, kind: output, shape index: {1}]  }
   0x1   :  { %v785_v0 = vld [vmem:[%s1140_s0] sm:$0xff]  ;;  %s723_s21 = smov 32   ;;  %v831_v17 = vld [vmem:[%s1140_s0 + $0x8] sm:$0xff]  ;;  %vm275_vm4 = vcmask 31744   ;;  %vm277_vm5 = vcmask 39936   ;;  %vm279_vm6 = vcmask 48128  }
   0x2   :  { %v790_v1 = vld [vmem:[%s1141_s1] sm:$0xf]  ;;  %v62_v4 = vrot.slane %v785_v0, 4  ;;  %v121_v46 = vrot.slane %v831_v17, 4  ;;  %vm281_vm7 = vcmask 56320   ;;  %vm283_vm8 = vcmask 64512  }
   0x3   :  { %v22_v2 = vmul.f32 %v790_v1, %v785_v0  ;;  %50 = vrot.lane.b32.xlu1 %v790_v1, %s721_s19  ;;  %v92_v19 = vmul.f32 %v790_v1, %v831_v17  ;;  %vm285_vm9 = vcmask 72704   ;;  %vm287_vm10 = vcmask 80896  }
   0x4   :  { %v64_v5 = vmul.f32 %v62_v4, %v790_v1  ;;  %v123_v48 = vmul.f32 %v121_v46, %v790_v1  ;;  %v874_v4 = vld [vmem:[%s1140_s0 + $0x10] sm:$0xff]  ;;  %vm289_vm11 = vcmask 89088   ;;  %vm291_vm12 = vcmask 97280  }
   0x5   :  { %v24_v3 = vsel %vm23_vm0, %v22_v2, 0.0  ;;  %v93_v20 = vsel %vm23_vm0, %v92_v19, 0.0  ;;  %vm293_vm13 = vcmask 105472   ;;  %vm295_vm14 = vcmask 113664  }
   0x6   :  { %25 = vadd.xlane.f32.xlu0 %v24_v3  ;;  %v65_v6 = vsel %vm23_vm0, %v64_v5, 0.0  ;;  %v124_v51 = vsel %vm23_vm0, %v123_v48, 0.0  ;;  %vm297_vm15 = vcmask 121856  }
   0x7   :  { %76 = vrot.lane.b32.xlu1 %v785_v0, %s722_s20 }
  0x1c   :  { %28 = vrot.lane.b32.xlu0 %v790_v1, %s723_s21 }
  0x20   :  { %39 = vrot.lane.b32.xlu0 %v790_v1, %s722_s20 }
  0x3f   :  { %66 = vadd.xlane.f32.xlu0 %v65_v6  ;;  %v151_v6 = vmul.f32 %v790_v1, %v874_v4 }
  0x55   :  { %68 = vrot.lane.b32.xlu0 %v785_v0, %s721_s19 }
  0x59   :  { %84 = vrot.lane.b32.xlu0 %v785_v0, %s723_s21 }
  0x75   :  { %v814_v9 = vpop.permute.xlu1 %50 }
  0x76   :  { %v53_v11 = vmul.f32 %v814_v9, %v785_v0  ;;  %v112_v31 = vmul.f32 %v814_v9, %v831_v17 }
  0x79   :  { %v77_v14 = vpop.permute.xlu1 %76 }
  0x7a   :  { %v78_v15 = vrot.slane %v77_v14, 4 }
  0x7c   :  { %v80_v16 = vmul.f32 %v78_v15, %v790_v1 }
  0x7e   :  { %v81_v18 = vsel %vm23_vm0, %v80_v16, 0.0 }
  0x8f   :  { %v810_v7 = vpop.xlane.xlu0 %25 }
  0x93   :  { %v812_v8 = vpop.permute.xlu0 %28 }
  0x94   :  { %v31_v10 = vmul.f32 %v812_v8, %v785_v0  ;;  %v96_v28 = vmul.f32 %v812_v8, %v831_v17 }
  0x96   :  { %33 = vrot.lane.b32.xlu1 %v31_v10, %s721_s19  ;;  %v152_v10 = vsel %vm23_vm0, %v151_v6, 0.0 }
  0x97   :  { %v821_v12 = vpop.permute.xlu0 %39 }
  0x98   :  { %v42_v13 = vmul.f32 %v821_v12, %v785_v0  ;;  %v104_v32 = vmul.f32 %v821_v12, %v831_v17 }
  0x9a   :  { %55 = vrot.lane.b32.xlu1 %v53_v11, %s723_s21  ;;  %44 = vrot.lane.b32.xlu0 %v42_v13, %s722_s20 }
  0xbe   :  { %82 = vadd.xlane.f32.xlu1 %v81_v18 }
  0xc2   :  { %94 = vadd.xlane.f32.xlu1 %v93_v20 }
  0xc8   :  { %v67_v21 = vpop.xlane.xlu0 %66 }
  0xcc   :  { %v69_v22 = vpop.permute.xlu0 %68 }
  0xcd   :  { %v70_v23 = vrot.slane %v69_v22, 4 }
  0xcf   :  { %v72_v24 = vmul.f32 %v70_v23, %v790_v1 }
  0xd0   :  { %v85_v25 = vpop.permute.xlu0 %84 }
  0xd1   :  { %v86_v26 = vrot.slane %v85_v25, 4  ;;  %v73_v27 = vsel %vm23_vm0, %v72_v24, 0.0  ;;  %v155_v24 = vmul.f32 %v812_v8, %v874_v4 }
  0xd2   :  { %74 = vadd.xlane.f32.xlu0 %v73_v27 }
  0xd3   :  { %98 = vrot.lane.b32.xlu1 %v96_v28, %s721_s19  ;;  %v88_v29 = vmul.f32 %v86_v26, %v790_v1 }
  0xd5   :  { %v89_v30 = vsel %vm23_vm0, %v88_v29, 0.0 }
  0xd6   :  { %90 = vadd.xlane.f32.xlu0 %v89_v30 }
  0xd7   :  { %114 = vrot.lane.b32.xlu1 %v112_v31, %s723_s21 }
  0xec   :  { %106 = vrot.lane.b32.xlu0 %v104_v32, %s722_s20 }
 0x108   :  { %v34_v33 = vpop.permute.xlu1 %33 }
 0x109   :  { %v36_v34 = vsel %vm23_vm0, %v34_v33, 0.0 }
 0x10a   :  { %37 = vadd.xlane.f32.xlu1 %v36_v34  ;;  %v171_v34 = vmul.f32 %v814_v9, %v874_v4 }
 0x10c   :  { %v45_v35 = vpop.permute.xlu0 %44  ;;  %v56_v36 = vpop.permute.xlu1 %55 }
 0x10d   :  { %v47_v37 = vsel %vm23_vm0, %v45_v35, 0.0  ;;  %v58_v38 = vsel %vm23_vm0, %v56_v36, 0.0 }
 0x10e   :  { %48 = vadd.xlane.f32.xlu0 %v47_v37  ;;  %59 = vadd.xlane.f32.xlu1 %v58_v38  ;;  %v163_v37 = vmul.f32 %v821_v12, %v874_v4 }
 0x147   :  { %v83_v39 = vpop.xlane.xlu1 %82 }
 0x14b   :  { %v95_v40 = vpop.xlane.xlu1 %94 }
 0x14f   :  { %v99_v41 = vpop.permute.xlu1 %98 }
 0x150   :  { %v101_v42 = vsel %vm23_vm0, %v99_v41, 0.0  ;;  %v180_v41 = vrot.slane %v874_v4, 4 }
 0x151   :  { %102 = vadd.xlane.f32.xlu1 %v101_v42 }
 0x153   :  { %v115_v43 = vpop.permute.xlu1 %114 }
 0x154   :  { %v117_v44 = vsel %vm23_vm0, %v115_v43, 0.0 }
 0x155   :  { %118 = vadd.xlane.f32.xlu1 %v117_v44  ;;  %v182_v44 = vmul.f32 %v180_v41, %v790_v1 }
 0x15b   :  { %v75_v45 = vpop.xlane.xlu0 %74 }
 0x15f   :  { %v91_v47 = vpop.xlane.xlu0 %90 }
 0x163   :  { %v107_v49 = vpop.permute.xlu0 %106 }
 0x164   :  { %v109_v50 = vsel %vm23_vm0, %v107_v49, 0.0 }
 0x165   :  { %110 = vadd.xlane.f32.xlu0 %v109_v50 }
 0x166   :  { %135 = vrot.lane.b32.xlu1 %v831_v17, %s722_s20 }
 0x169   :  { %125 = vadd.xlane.f32.xlu0 %v124_v51 }
 0x17f   :  { %127 = vrot.lane.b32.xlu0 %v831_v17, %s721_s19 }
 0x193   :  { %v38_v52 = vpop.xlane.xlu1 %37 }
 0x194   :  { %v270_v53 = vsel %vm269_vm1, %v810_v7, %v38_v52 }
 0x197   :  { %v49_v54 = vpop.xlane.xlu0 %48  ;;  %v60_v55 = vpop.xlane.xlu1 %59 }
 0x198   :  { %v272_v56 = vsel %vm271_vm2, %v270_v53, %v49_v54 }
 0x199   :  { %v274_v57 = vsel %vm273_vm3, %v272_v56, %v60_v55 }
 0x19a   :  { %v276_v58 = vsel %vm275_vm4, %v274_v57, %v67_v21 }
 0x19b   :  { %v278_v59 = vsel %vm277_vm5, %v276_v58, %v75_v45  ;;  %v924_v58 = vld [vmem:[%s1140_s0 + $0x18] sm:$0xff]  ;;  %s724_s0 = smov 16  }
 0x19c   :  { %v280_v60 = vsel %vm279_vm6, %v278_v59, %v83_v39 }
 0x19d   :  { %v282_v61 = vsel %vm281_vm7, %v280_v60, %v91_v47  ;;  %v183_v47 = vsel %vm23_vm0, %v182_v44, 0.0  ;;  %v222_v60 = vmul.f32 %v821_v12, %v924_v58  ;;  %v214_v12 = vmul.f32 %v812_v8, %v924_v58 }
 0x19e   :  { %v284_v11 = vsel %vm283_vm8, %v282_v61, %v95_v40 }
 0x1da   :  { %v103_v62 = vpop.xlane.xlu1 %102 }
 0x1db   :  { %v286_v13 = vsel %vm285_vm9, %v284_v11, %v103_v62  ;;  %v230_v11 = vmul.f32 %v814_v9, %v924_v58 }
 0x1de   :  { %v119_v63 = vpop.xlane.xlu1 %118 }
 0x1e2   :  { %v136_v2 = vpop.permute.xlu1 %135 }
 0x1e3   :  { %v137_v3 = vrot.slane %v136_v2, 4 }
 0x1e5   :  { %v139_v5 = vmul.f32 %v137_v3, %v790_v1  ;;  %v210_v3 = vmul.f32 %v790_v1, %v924_v58 }
 0x1e7   :  { %v140_v7 = vsel %vm23_vm0, %v139_v5, 0.0  ;;  %v239_v5 = vrot.slane %v924_v58, 4  ;;  %v211_v6 = vsel %vm23_vm0, %v210_v3, 0.0 }
 0x1e8   :  { %141 = vadd.xlane.f32.xlu1 %v140_v7 }
 0x1e9   :  { %v241_v7 = vmul.f32 %v239_v5, %v790_v1 }
 0x1ec   :  { %153 = vadd.xlane.f32.xlu1 %v152_v10  ;;  %v242_v10 = vsel %vm23_vm0, %v241_v7, 0.0  ;;  %v730_v7 = vmov 3  }
 0x1ee   :  { %v111_v14 = vpop.xlane.xlu0 %110 }
 0x1ef   :  { %v288_v15 = vsel %vm287_vm10, %v286_v13, %v111_v14 }
 0x1f0   :  { %v290_v16 = vsel %vm289_vm11, %v288_v15, %v119_v63 }
 0x1f2   :  { %v126_v18 = vpop.xlane.xlu0 %125 }
 0x1f3   :  { %v292_v19 = vsel %vm291_vm12, %v290_v16, %v126_v18 }
 0x1f6   :  { %v128_v20 = vpop.permute.xlu0 %127 }
 0x1f7   :  { %v129_v21 = vrot.slane %v128_v20, 4 }
 0x1f9   :  { %v131_v22 = vmul.f32 %v129_v21, %v790_v1 }
 0x1fb   :  { %v132_v23 = vsel %vm23_vm0, %v131_v22, 0.0 }
 0x1fc   :  { %133 = vadd.xlane.f32.xlu0 %v132_v23 }
 0x1fd   :  { %157 = vrot.lane.b32.xlu1 %v155_v24, %s721_s19 }
 0x212   :  { %143 = vrot.lane.b32.xlu0 %v831_v17, %s723_s21 }
 0x271   :  { %v142_v25 = vpop.xlane.xlu1 %141 }
 0x275   :  { %v154_v26 = vpop.xlane.xlu1 %153 }
 0x279   :  { %v158_v27 = vpop.permute.xlu1 %157 }
 0x27a   :  { %v160_v28 = vsel %vm23_vm0, %v158_v27, 0.0 }
 0x27b   :  { %161 = vadd.xlane.f32.xlu1 %v160_v28 }
 0x285   :  { %v134_v29 = vpop.xlane.xlu0 %133 }
 0x286   :  { %v294_v30 = vsel %vm293_vm13, %v292_v19, %v134_v29 }
 0x287   :  { %v296_v31 = vsel %vm295_vm14, %v294_v30, %v142_v25 }
 0x289   :  { %v144_v32 = vpop.permute.xlu0 %143 }
 0x28a   :  { %v145_v33 = vrot.slane %v144_v32, 4 }
 0x28c   :  { %173 = vrot.lane.b32.xlu1 %v171_v34, %s723_s21  ;;  %v147_v35 = vmul.f32 %v145_v33, %v790_v1 }
 0x28e   :  { %v148_v36 = vsel %vm23_vm0, %v147_v35, 0.0 }
 0x28f   :  { %149 = vadd.xlane.f32.xlu0 %v148_v36 }
 0x2a5   :  { %165 = vrot.lane.b32.xlu0 %v163_v37, %s722_s20 }
 0x304   :  { %v162_v38 = vpop.xlane.xlu1 %161 }
 0x305   :  { %v299_v53 = vsel %vm269_vm1, %v154_v26, %v162_v38  ;;  %vm318_vm1 = vcmask 130048  }
 0x308   :  { %v174_v39 = vpop.permute.xlu1 %173 }
 0x309   :  { %v176_v40 = vsel %vm23_vm0, %v174_v39, 0.0 }
 0x30a   :  { %177 = vadd.xlane.f32.xlu1 %v176_v40 }
 0x318   :  { %v150_v42 = vpop.xlane.xlu0 %149 }
 0x319   :  { %v907_v43 = vsel %vm297_vm15, %v296_v31, %v150_v42 }
 0x31b   :  { %194 = vrot.lane.b32.xlu1 %v874_v4, %s722_s20 }
 0x31c   :  { %v166_v45 = vpop.permute.xlu0 %165 }
 0x31d   :  { %v168_v46 = vsel %vm23_vm0, %v166_v45, 0.0 }
 0x31e   :  { %169 = vadd.xlane.f32.xlu0 %v168_v46 }
 0x322   :  { %184 = vadd.xlane.f32.xlu0 %v183_v47 }
 0x338   :  { %186 = vrot.lane.b32.xlu0 %v874_v4, %s721_s19 }
 0x393   :  { %v178_v48 = vpop.xlane.xlu1 %177 }
 0x397   :  { %v195_v49 = vpop.permute.xlu1 %194 }
 0x398   :  { %v196_v50 = vrot.slane %v195_v49, 4 }
 0x39a   :  { %v198_v51 = vmul.f32 %v196_v50, %v790_v1 }
 0x39c   :  { %v199_v52 = vsel %vm23_vm0, %v198_v51, 0.0 }
 0x39d   :  { %200 = vadd.xlane.f32.xlu1 %v199_v52 }
 0x3a7   :  { %v170_v54 = vpop.xlane.xlu0 %169 }
 0x3a8   :  { %v300_v55 = vsel %vm271_vm2, %v299_v53, %v170_v54  ;;  %vm537_vm2 = vcmask 261120  }
 0x3a9   :  { %v301_v56 = vsel %vm273_vm3, %v300_v55, %v178_v48  ;;  %vm539_vm3 = vcmask 523264  }
 0x3ab   :  { %v185_v57 = vpop.xlane.xlu0 %184 }
 0x3ac   :  { %v302_v59 = vsel %vm275_vm4, %v301_v56, %v185_v57  ;;  %vm541_vm4 = vcmask 785408  }
 0x3ae   :  { %224 = vrot.lane.b32.xlu1 %v222_v60, %s722_s20 }
 0x3af   :  { %v187_v61 = vpop.permute.xlu0 %186 }
 0x3b0   :  { %v188_v62 = vrot.slane %v187_v61, 4 }
 0x3b2   :  { %v190_v63 = vmul.f32 %v188_v62, %v790_v1  ;;  %v725_v62 = vmov 10  }
 0x3b3   :  { %696 = vset.pattern.permute.xlu0 %v725_v62 }
 0x3b4   :  { %v191_v2 = vsel %vm23_vm0, %v190_v63, 0.0  ;;  %v726_v63 = vmov 1  }
 0x3b5   :  { %192 = vadd.xlane.f32.xlu0 %v191_v2  ;;  %687 = vset.pattern.permute.xlu1 %v726_v63 }
 0x3cb   :  { %202 = vrot.lane.b32.xlu0 %v874_v4, %s723_s21 }
 0x3cf   :  { %216 = vrot.lane.b32.xlu0 %v214_v12, %s721_s19 }
 0x3d2   :  { %212 = vadd.xlane.f32.xlu1 %v211_v6  ;;  %v729_v6 = vmov 16  }
 0x3d3   :  { %245 = vrot.lane.b32.xlu0 %v924_v58, %s721_s19 }
 0x3d6   :  { %243 = vadd.xlane.f32.xlu1 %v242_v10  ;;  %v731_v10 = vmov 19  }
 0x3d7   :  { %253 = vrot.lane.b32.xlu0 %v924_v58, %s722_s20 }
 0x3db   :  { %232 = vrot.lane.b32.xlu0 %v230_v11, %s723_s21  ;;  %v732_v11 = vmov 4  }
 0x3df   :  { %261 = vrot.lane.b32.xlu0 %v924_v58, %s723_s21 }
 0x426   :  { %v201_v13 = vpop.xlane.xlu1 %200 }
 0x42a   :  { %v225_v23 = vpop.permute.xlu1 %224 }
 0x42b   :  { %v227_v27 = vsel %vm23_vm0, %v225_v23, 0.0  ;;  %v744_v23 = vmov 12  }
 0x43e   :  { %v193_v8 = vpop.xlane.xlu0 %192 }
 0x43f   :  { %v303_v14 = vsel %vm277_vm5, %v302_v59, %v193_v8  ;;  %v733_v8 = vmov 22  }
 0x440   :  { %v304_v15 = vsel %vm279_vm6, %v303_v14, %v201_v13  ;;  %v734_v13 = vmov 5   ;;  %v735_v14 = vmov 25  }
 0x442   :  { %v203_v16 = vpop.permute.xlu0 %202 }
 0x443   :  { %v204_v18 = vrot.slane %v203_v16, 4  ;;  %v737_v16 = vmov 28  }
 0x445   :  { %v206_v19 = vmul.f32 %v204_v18, %v790_v1  ;;  %v738_v18 = vmov 7  }
 0x446   :  { %v217_v20 = vpop.permute.xlu0 %216 }
 0x447   :  { %v207_v21 = vsel %vm23_vm0, %v206_v19, 0.0  ;;  %v219_v22 = vsel %vm23_vm0, %v217_v20, 0.0  ;;  %v739_v19 = vmov 31   ;;  %v740_v20 = vmov 8  }
 0x448   :  { %208 = vadd.xlane.f32.xlu0 %v207_v21  ;;  %v741_v21 = vmov 0  }
 0x44a   :  { %v246_v9 = vpop.permute.xlu0 %245 }
 0x44b   :  { %v247_v25 = vrot.slane %v246_v9, 4  ;;  %v742_v9 = vmov 9  }
 0x44c   :  { %220 = vadd.xlane.f32.xlu0 %v219_v22  ;;  %v743_v22 = vmov 11  }
 0x44d   :  { %v249_v32 = vmul.f32 %v247_v25, %v790_v1  ;;  %v746_v25 = vmov 15  }
 0x44e   :  { %v254_v24 = vpop.permute.xlu0 %253 }
 0x44f   :  { %v255_v26 = vrot.slane %v254_v24, 4  ;;  %v250_v35 = vsel %vm23_vm0, %v249_v32, 0.0  ;;  %v745_v24 = vmov 14   ;;  %v753_v32 = vmov 26  }
 0x450   :  { %228 = vadd.xlane.f32.xlu0 %v227_v27  ;;  %v748_v27 = vmov 18  }
 0x451   :  { %v257_v28 = vmul.f32 %v255_v26, %v790_v1  ;;  %v747_v26 = vmov 17  }
 0x452   :  { %v233_v29 = vpop.permute.xlu0 %232 }
 0x453   :  { %v258_v30 = vsel %vm23_vm0, %v257_v28, 0.0  ;;  %v235_v31 = vsel %vm23_vm0, %v233_v29, 0.0  ;;  %v749_v28 = vmov 20   ;;  %v750_v29 = vmov 21  }
 0x454   :  { %259 = vadd.xlane.f32.xlu1 %v258_v30  ;;  %236 = vadd.xlane.f32.xlu0 %v235_v31  ;;  %v751_v30 = vmov 23   ;;  %v752_v31 = vmov 24  }
 0x456   :  { %v262_v33 = vpop.permute.xlu0 %261 }
 0x457   :  { %v263_v34 = vrot.slane %v262_v33, 4  ;;  %v754_v33 = vmov 27  }
 0x458   :  { %251 = vadd.xlane.f32.xlu0 %v250_v35  ;;  %v756_v35 = vmov 30  }
 0x459   :  { %v265_v36 = vmul.f32 %v263_v34, %v790_v1  ;;  %v755_v34 = vmov 29  }
 0x45b   :  { %v266_v37 = vsel %vm23_vm0, %v265_v36, 0.0  ;;  %v213_v41 = vpop.xlane.xlu1 %212 }
 0x45c   :  { %267 = vadd.xlane.f32.xlu0 %v266_v37 }
 0x45f   :  { %v244_v48 = vpop.xlane.xlu1 %243 }
 0x4d1   :  { %v209_v38 = vpop.xlane.xlu0 %208 }
 0x4d2   :  { %v305_v40 = vsel %vm281_vm7, %v304_v15, %v209_v38  ;;  %v736_v15 = vmov 6  }
 0x4d3   :  { %v306_v44 = vsel %vm283_vm8, %v305_v40, %v213_v41 }
 0x4d5   :  { %v221_v39 = vpop.xlane.xlu0 %220 }
 0x4d6   :  { %v307_v45 = vsel %vm285_vm9, %v306_v44, %v221_v39 }
 0x4d9   :  { %v229_v42 = vpop.xlane.xlu0 %228 }
 0x4da   :  { %v308_v46 = vsel %vm287_vm10, %v307_v45, %v229_v42 }
 0x4dd   :  { %v237_v47 = vpop.xlane.xlu0 %236  ;;  %v260_v53 = vpop.xlane.xlu1 %259 }
 0x4de   :  { %v309_v49 = vsel %vm289_vm11, %v308_v46, %v237_v47 }
 0x4df   :  { %v310_v50 = vsel %vm291_vm12, %v309_v49, %v244_v48 }
 0x4e1   :  { %v252_v51 = vpop.xlane.xlu0 %251 }
 0x4e2   :  { %v311_v52 = vsel %vm293_vm13, %v310_v50, %v252_v51 }
 0x4e3   :  { %v312_v55 = vsel %vm295_vm14, %v311_v52, %v260_v53 }
 0x4e5   :  { %v268_v54 = vpop.xlane.xlu0 %267 }
 0x4e6   :  { %v313_v56 = vsel %vm297_vm15, %v312_v55, %v268_v54 }
 0x4e7   :  { %315 = vrot.lane.b32.xlu1 %v313_v56, %s724_s0 }
 0x559   :  { %v316_v57 = vpop.permute.xlu1 %315 }
 0x55a   :  { %v975_v59 = vsel %vm318_vm1, %v907_v43, %v316_v57  ;;  %v727_v43 = vmov 13  }
 0x55b   :  { %v320_v60 = vmul.f32 %v975_v59, %v790_v1  ;;  %v728_v1 = vmov 2  }
 0x55d   :  { %v321_v61 = vsel %vm23_vm0, %v320_v60, 0.0 }
 0x55e   :  { %322 = vadd.xlane.f32.xlu0 %v321_v61 }
 0x5e7   :  { %v323_v2 = vpop.xlane.xlu0 %322 }
 0x5e8   :  { %v324_v3 = vadd.f32 1.0, %v323_v2 }
 0x5ea   :  { %719 = vrcp.f32 %v324_v3 }
 0x5f7   :  { %v720_v5 = vpop.eup %719 }
 0x5f8   :  { %v981_v12 = vmul.f32 %v720_v5, %v975_v59 }
 0x5fa   :  { %380 = vperm.xlu0 %696, %v981_v12   ;;  %335 = vperm.xlu1 %687, %v981_v12  }
 0x5fe   :  { %699 = vset.pattern.permute.xlu0 %v727_v43  ;;  %688 = vset.pattern.permute.xlu1 %v728_v1 }
 0x5ff   :  { %395 = vperm.xlu0 %699, %v981_v12   ;;  %340 = vperm.xlu1 %688, %v981_v12  }
 0x603   :  { %702 = vset.pattern.permute.xlu0 %v729_v6  ;;  %689 = vset.pattern.permute.xlu1 %v730_v7 }
 0x604   :  { %410 = vperm.xlu0 %702, %v981_v12   ;;  %345 = vperm.xlu1 %689, %v981_v12  }
 0x608   :  { %705 = vset.pattern.permute.xlu0 %v731_v10  ;;  %690 = vset.pattern.permute.xlu1 %v732_v11 }
 0x609   :  { %425 = vperm.xlu0 %705, %v981_v12   ;;  %350 = vperm.xlu1 %690, %v981_v12  }
 0x60d   :  { %708 = vset.pattern.permute.xlu0 %v733_v8  ;;  %691 = vset.pattern.permute.xlu1 %v734_v13 }
 0x60e   :  { %440 = vperm.xlu0 %708, %v981_v12   ;;  %355 = vperm.xlu1 %691, %v981_v12  }
 0x612   :  { %711 = vset.pattern.permute.xlu0 %v735_v14  ;;  %692 = vset.pattern.permute.xlu1 %v736_v15 }
 0x613   :  { %455 = vperm.xlu0 %711, %v981_v12   ;;  %360 = vperm.xlu1 %692, %v981_v12  }
 0x617   :  { %714 = vset.pattern.permute.xlu0 %v737_v16  ;;  %693 = vset.pattern.permute.xlu1 %v738_v18 }
 0x618   :  { %470 = vperm.xlu0 %714, %v981_v12   ;;  %365 = vperm.xlu1 %693, %v981_v12  }
 0x61c   :  { %717 = vset.pattern.permute.xlu0 %v739_v19  ;;  %694 = vset.pattern.permute.xlu1 %v740_v20 }
 0x61d   :  { %485 = vperm.xlu0 %717, %v981_v12   ;;  %370 = vperm.xlu1 %694, %v981_v12  }
 0x621   :  { %718 = vset.pattern.permute.xlu0 %v741_v21  ;;  %695 = vset.pattern.permute.xlu1 %v742_v9 }
 0x622   :  { %330 = vperm.xlu0 %718, %v981_v12   ;;  %375 = vperm.xlu1 %695, %v981_v12  }
 0x626   :  { %697 = vset.pattern.permute.xlu1 %v743_v22 }
 0x627   :  { %385 = vperm.xlu1 %697, %v981_v12  }
 0x62b   :  { %698 = vset.pattern.permute.xlu1 %v744_v23 }
 0x62c   :  { %390 = vperm.xlu1 %698, %v981_v12  }
 0x630   :  { %700 = vset.pattern.permute.xlu1 %v745_v24 }
 0x631   :  { %400 = vperm.xlu1 %700, %v981_v12  }
 0x635   :  { %701 = vset.pattern.permute.xlu1 %v746_v25 }
 0x636   :  { %405 = vperm.xlu1 %701, %v981_v12  }
 0x63a   :  { %703 = vset.pattern.permute.xlu1 %v747_v26 }
 0x63b   :  { %415 = vperm.xlu1 %703, %v981_v12  }
 0x63f   :  { %704 = vset.pattern.permute.xlu1 %v748_v27 }
 0x640   :  { %420 = vperm.xlu1 %704, %v981_v12  }
 0x644   :  { %706 = vset.pattern.permute.xlu1 %v749_v28 }
 0x645   :  { %430 = vperm.xlu1 %706, %v981_v12  }
 0x649   :  { %707 = vset.pattern.permute.xlu1 %v750_v29 }
 0x64a   :  { %435 = vperm.xlu1 %707, %v981_v12  }
 0x64e   :  { %709 = vset.pattern.permute.xlu1 %v751_v30 }
 0x64f   :  { %445 = vperm.xlu1 %709, %v981_v12  }
 0x653   :  { %710 = vset.pattern.permute.xlu1 %v752_v31 }
 0x654   :  { %450 = vperm.xlu1 %710, %v981_v12  }
 0x658   :  { %712 = vset.pattern.permute.xlu1 %v753_v32 }
 0x659   :  { %460 = vperm.xlu1 %712, %v981_v12  }
 0x65d   :  { %713 = vset.pattern.permute.xlu1 %v754_v33  ;;  %v21_v33 = vld [vmem:[%s1142_s2] sm:$0xf] }
 0x65e   :  { %465 = vperm.xlu1 %713, %v981_v12  }
 0x662   :  { %715 = vset.pattern.permute.xlu1 %v755_v34 }
 0x663   :  { %475 = vperm.xlu1 %715, %v981_v12  }
 0x667   :  { %716 = vset.pattern.permute.xlu1 %v756_v35 }
 0x668   :  { %480 = vperm.xlu1 %716, %v981_v12  }
 0x675   :  { %v336_v36 = vpop.permute.xlu1 %335  ;;  %v381_v48 = vpop.permute.xlu0 %380 }
 0x676   :  { %v338_v37 = vmul.f32 %v336_v36, %v975_v59  ;;  %v383_v51 = vmul.f32 %v381_v48, %v975_v59 }
 0x678   :  { %490 = vrot.lane.b32.xlu1 %v338_v37, %s723_s21 }
 0x67a   :  { %v341_v38 = vpop.permute.xlu1 %340  ;;  %v396_v53 = vpop.permute.xlu0 %395 }
 0x67b   :  { %v343_v39 = vmul.f32 %v341_v38, %v975_v59  ;;  %v398_v54 = vmul.f32 %v396_v53, %v975_v59 }
 0x67d   :  { %494 = vrot.lane.b32.xlu1 %v343_v39, %s722_s20 }
 0x67f   :  { %v346_v40 = vpop.permute.xlu1 %345  ;;  %v1042_v2 = vpop.permute.xlu0 %410 }
 0x680   :  { %v348_v41 = vmul.f32 %v346_v40, %v975_v59 }
 0x682   :  { %498 = vrot.lane.b32.xlu0 %v348_v41, %s721_s19 }
 0x684   :  { %v1021_v42 = vpop.permute.xlu1 %350  ;;  %v426_v43 = vpop.permute.xlu0 %425 }
 0x685   :  { %v428_v10 = vmul.f32 %v426_v43, %v975_v59  ;;  %v353_v39 = vmul.f32 %v1021_v42, %v975_v59 }
 0x689   :  { %v356_v44 = vpop.permute.xlu1 %355  ;;  %v441_v7 = vpop.permute.xlu0 %440 }
 0x68a   :  { %v358_v45 = vmul.f32 %v356_v44, %v975_v59  ;;  %v443_v13 = vmul.f32 %v441_v7, %v975_v59 }
 0x68c   :  { %502 = vrot.lane.b32.xlu1 %v358_v45, %s723_s21 }
 0x68e   :  { %v361_v46 = vpop.permute.xlu1 %360  ;;  %v456_v14 = vpop.permute.xlu0 %455 }
 0x68f   :  { %v363_v47 = vmul.f32 %v361_v46, %v975_v59  ;;  %v458_v16 = vmul.f32 %v456_v14, %v975_v59 }
 0x691   :  { %506 = vrot.lane.b32.xlu0 %v363_v47, %s722_s20 }
 0x693   :  { %v366_v49 = vpop.permute.xlu1 %365  ;;  %v1067_v25 = vpop.permute.xlu0 %470 }
 0x694   :  { %v368_v50 = vmul.f32 %v366_v49, %v975_v59 }
 0x696   :  { %510 = vrot.lane.b32.xlu1 %v368_v50, %s721_s19 }
 0x698   :  { %v1030_v52 = vpop.permute.xlu1 %370  ;;  %v486_v29 = vpop.permute.xlu0 %485 }
 0x699   :  { %v488_v30 = vmul.f32 %v486_v29, %v975_v59  ;;  %v473_v29 = vmul.f32 %v1067_v25, %v975_v59 }
 0x69a   :  { %518 = vrot.lane.b32.xlu1 %v383_v51, %s722_s20 }
 0x69d   :  { %v376_v55 = vpop.permute.xlu1 %375  ;;  %v331_v35 = vpop.permute.xlu0 %330 }
 0x69e   :  { %v378_v56 = vmul.f32 %v376_v55, %v975_v59  ;;  %526 = vrot.lane.b32.xlu1 %v398_v54, %s723_s21  ;;  %v333_v40 = vmul.f32 %v331_v35, %v975_v59 }
 0x6a0   :  { %514 = vrot.lane.b32.xlu0 %v378_v56, %s723_s21  ;;  %v373_v56 = vmul.f32 %v1030_v52, %v975_v59 }
 0x6a2   :  { %v386_v57 = vpop.permute.xlu1 %385 }
 0x6a3   :  { %v388_v60 = vmul.f32 %v386_v57, %v975_v59 }
 0x6a5   :  { %522 = vrot.lane.b32.xlu0 %v388_v60, %s721_s19 }
 0x6a7   :  { %v1039_v61 = vpop.permute.xlu1 %390 }
 0x6a8   :  { %v393_v60 = vmul.f32 %v1039_v61, %v975_v59 }
 0x6ac   :  { %v401_v62 = vpop.permute.xlu1 %400 }
 0x6ad   :  { %v403_v63 = vmul.f32 %v401_v62, %v975_v59 }
 0x6af   :  { %530 = vrot.lane.b32.xlu0 %v403_v63, %s722_s20 }
 0x6b1   :  { %v406_v3 = vpop.permute.xlu1 %405 }
 0x6b2   :  { %v408_v5 = vmul.f32 %v406_v3, %v975_v59 }
 0x6b4   :  { %534 = vrot.lane.b32.xlu1 %v408_v5, %s721_s19 }
 0x6b6   :  { %v416_v1 = vpop.permute.xlu1 %415 }
 0x6b7   :  { %v418_v6 = vmul.f32 %v416_v1, %v975_v59 }
 0x6b9   :  { %553 = vrot.lane.b32.xlu0 %v418_v6, %s723_s21 }
 0x6bb   :  { %v421_v11 = vpop.permute.xlu1 %420 }
 0x6bc   :  { %v423_v8 = vmul.f32 %v421_v11, %v975_v59 }
 0x6bd   :  { %561 = vrot.lane.b32.xlu0 %v428_v10, %s721_s19 }
 0x6be   :  { %557 = vrot.lane.b32.xlu1 %v423_v8, %s722_s20  ;;  %v413_v8 = vmul.f32 %v1042_v2, %v975_v59 }
 0x6c0   :  { %v1054_v15 = vpop.permute.xlu1 %430 }
 0x6c1   :  { %569 = vrot.lane.b32.xlu0 %v443_v13, %s722_s20  ;;  %v433_v13 = vmul.f32 %v1054_v15, %v975_v59 }
 0x6c5   :  { %577 = vrot.lane.b32.xlu0 %v458_v16, %s723_s21  ;;  %v436_v18 = vpop.permute.xlu1 %435 }
 0x6c6   :  { %v438_v19 = vmul.f32 %v436_v18, %v975_v59 }
 0x6c8   :  { %565 = vrot.lane.b32.xlu1 %v438_v19, %s723_s21 }
 0x6ca   :  { %v446_v20 = vpop.permute.xlu1 %445 }
 0x6cb   :  { %v448_v21 = vmul.f32 %v446_v20, %v975_v59 }
 0x6cd   :  { %573 = vrot.lane.b32.xlu1 %v448_v21, %s721_s19 }
 0x6cf   :  { %v1063_v9 = vpop.permute.xlu1 %450 }
 0x6d4   :  { %v461_v22 = vpop.permute.xlu1 %460 }
 0x6d5   :  { %v463_v23 = vmul.f32 %v461_v22, %v975_v59 }
 0x6d7   :  { %581 = vrot.lane.b32.xlu1 %v463_v23, %s722_s20 }
 0x6d9   :  { %v466_v24 = vpop.permute.xlu1 %465 }
 0x6da   :  { %v468_v26 = vmul.f32 %v466_v24, %v975_v59 }
 0x6dc   :  { %585 = vrot.lane.b32.xlu0 %v468_v26, %s721_s19 }
 0x6de   :  { %v476_v27 = vpop.permute.xlu1 %475 }
 0x6df   :  { %v478_v28 = vmul.f32 %v476_v27, %v975_v59 }
 0x6e1   :  { %589 = vrot.lane.b32.xlu1 %v478_v28, %s723_s21 }
 0x6e3   :  { %v481_v31 = vpop.permute.xlu1 %480 }
 0x6e4   :  { %v483_v32 = vmul.f32 %v481_v31, %v975_v59 }
 0x6e5   :  { %597 = vrot.lane.b32.xlu1 %v488_v30, %s721_s19  ;;  %v453_v30 = vmul.f32 %v1063_v9, %v975_v59 }
 0x6e6   :  { %593 = vrot.lane.b32.xlu0 %v483_v32, %s722_s20 }
 0x6ea   :  { %638 = vperm.xlu0 %718, %v21_v33   ;;  %v491_v34 = vpop.permute.xlu1 %490 }
 0x6eb   :  { %v538_v44 = vsel %vm537_vm2, %v333_v40, %v491_v34 }
 0x6ef   :  { %v495_v36 = vpop.permute.xlu1 %494 }
 0x6f0   :  { %v540_v46 = vsel %vm539_vm3, %v538_v44, %v495_v36 }
 0x6f4   :  { %v499_v37 = vpop.permute.xlu0 %498 }
 0x6f5   :  { %v542_v49 = vsel %vm541_vm4, %v540_v46, %v499_v37 }
 0x6fe   :  { %v503_v38 = vpop.permute.xlu1 %502 }
 0x6ff   :  { %v543_v45 = vsel %vm537_vm2, %v353_v39, %v503_v38 }
 0x703   :  { %v507_v41 = vpop.permute.xlu0 %506 }
 0x704   :  { %v544_v47 = vsel %vm539_vm3, %v543_v45, %v507_v41 }
 0x708   :  { %v511_v48 = vpop.permute.xlu1 %510 }
 0x709   :  { %v545_v50 = vsel %vm541_vm4, %v544_v47, %v511_v48 }
 0x70a   :  { %v620_v51 = vcombine.low %v542_v49, %v545_v50 }
 0x70c   :  { %v628_v42 = vsub.f32 %v785_v0, %v620_v51  ;;  %v519_v54 = vpop.permute.xlu1 %518 }
 0x70e   :  { %632 = vst [vmem:[%s1143_s3] sm:$0xff] %v628_v42 }
 0x710   :  { %v527_v57 = vpop.permute.xlu1 %526 }
 0x711   :  { %v549_v3 = vsel %vm537_vm2, %v393_v60, %v527_v57 }
 0x712   :  { %v515_v53 = vpop.permute.xlu0 %514 }
 0x713   :  { %v546_v62 = vsel %vm537_vm2, %v373_v56, %v515_v53 }
 0x714   :  { %v547_v0 = vsel %vm539_vm3, %v546_v62, %v519_v54 }
 0x717   :  { %v523_v55 = vpop.permute.xlu0 %522 }
 0x718   :  { %v548_v1 = vsel %vm541_vm4, %v547_v0, %v523_v55 }
 0x721   :  { %v531_v63 = vpop.permute.xlu0 %530 }
 0x722   :  { %v550_v5 = vsel %vm539_vm3, %v549_v3, %v531_v63 }
 0x726   :  { %v535_v43 = vpop.permute.xlu1 %534 }
 0x727   :  { %v551_v6 = vsel %vm541_vm4, %v550_v5, %v535_v43 }
 0x728   :  { %v621_v7 = vcombine.low %v548_v1, %v551_v6 }
 0x72a   :  { %v629_v52 = vsub.f32 %v831_v17, %v621_v7 }
 0x72b   :  { %v554_v61 = vpop.permute.xlu0 %553 }
 0x72c   :  { %633 = vst [vmem:[%s1143_s3 + $0x8] sm:$0xff] %v629_v52  ;;  %v600_v16 = vsel %vm537_vm2, %v413_v8, %v554_v61 }
 0x72f   :  { %v562_v11 = vpop.permute.xlu0 %561 }
 0x730   :  { %v558_v10 = vpop.permute.xlu1 %557 }
 0x731   :  { %v601_v17 = vsel %vm539_vm3, %v600_v16, %v558_v10 }
 0x732   :  { %v602_v22 = vsel %vm541_vm4, %v601_v17, %v562_v11 }
 0x733   :  { %v570_v19 = vpop.permute.xlu0 %569 }
 0x737   :  { %v578_v26 = vpop.permute.xlu0 %577 }
 0x738   :  { %v606_v31 = vsel %vm537_vm2, %v453_v30, %v578_v26 }
 0x73a   :  { %v566_v14 = vpop.permute.xlu1 %565 }
 0x73b   :  { %v603_v18 = vsel %vm537_vm2, %v433_v13, %v566_v14 }
 0x73c   :  { %v604_v20 = vsel %vm539_vm3, %v603_v18, %v570_v19 }
 0x73f   :  { %v574_v21 = vpop.permute.xlu1 %573 }
 0x740   :  { %v605_v23 = vsel %vm541_vm4, %v604_v20, %v574_v21 }
 0x741   :  { %v622_v24 = vcombine.low %v602_v22, %v605_v23 }
 0x743   :  { %v630_v2 = vsub.f32 %v874_v4, %v622_v24 }
 0x745   :  { %634 = vst [vmem:[%s1143_s3 + $0x10] sm:$0xff] %v630_v2 }
 0x749   :  { %v582_v15 = vpop.permute.xlu1 %581 }
 0x74a   :  { %v607_v4 = vsel %vm539_vm3, %v606_v31, %v582_v15 }
 0x74e   :  { %v586_v28 = vpop.permute.xlu0 %585 }
 0x74f   :  { %v608_v36 = vsel %vm541_vm4, %v607_v4, %v586_v28 }
 0x753   :  { %v590_v27 = vpop.permute.xlu1 %589 }
 0x754   :  { %v609_v32 = vsel %vm537_vm2, %v473_v29, %v590_v27 }
 0x757   :  { %v598_v34 = vpop.permute.xlu1 %597 }
 0x758   :  { %v594_v33 = vpop.permute.xlu0 %593 }
 0x759   :  { %v610_v35 = vsel %vm539_vm3, %v609_v32, %v594_v33 }
 0x75a   :  { %v611_v37 = vsel %vm541_vm4, %v610_v35, %v598_v34 }
 0x75b   :  { %v623_v38 = vcombine.low %v608_v36, %v611_v37 }
 0x75d   :  { %v631_v25 = vsub.f32 %v924_v58, %v623_v38 }
 0x75f   :  { %635 = vst [vmem:[%s1143_s3 + $0x18] sm:$0xff] %v631_v25 }
 0x765   :  { %v639_v59 = vpop.permute.xlu0 %638 }
 0x766   :  { %v641_v9 = vmul.f32 %v639_v59, %v981_v12 }
 0x768   :  { %642 = vst.msk [vmem:[%s1144_s4] sm:$0xf] %vm23_vm0, %v641_v9 }

</bundles_post_ra>
